<compile_context>
chip_gen: v6e
topology: v6e:2x2x1
jax: 0.10.0
libtpu: 0.0.40
codegen_flags: <defaults>
</compile_context>

<pallas_src>
import jax
import jax.numpy as jnp
from jax.experimental import pallas as pl
from jax.experimental.pallas import tpu as pltpu


def _inner_product_decoder_kernel(z_row_ref, z_colT_ref, adj_ref):
    """One (tm, tn) tile of sigmoid(z @ z.T), computed in a single shot."""
    # (tm, K) x (K, tn) -> (tm, tn), f32 accumulation on the MXU.
    logits = jnp.dot(
        z_row_ref[...], z_colT_ref[...], preferred_element_type=jnp.float32
    )
    # sigmoid(x) == 0.5 * tanh(0.5 * x) + 0.5  -> single EUP op per element.
    probs = 0.5 * jnp.tanh(0.5 * logits) + 0.5
    adj_ref[...] = probs.astype(adj_ref.dtype)


def _round_up(x, m):
    return -(-x // m) * m


def inner_product_decoder(
    z,
    *,
    dropout=0.0,
    training=False,
    rng_key=None,
    tm=1024,
    tn=512,
    out_dtype=None,
    compute_dtype=None,
):
    """sigmoid(dropout(z) @ dropout(z).T) for z of shape [N, D].

    Eval mode (training=False): dropout is identity, matching nn.Module eval.
    Training mode: inverted-dropout mask applied to z in the wrapper (needs
    rng_key) so both operand views share the same mask.
    """
    N, D = z.shape
    out_dtype = jnp.dtype(z.dtype) if out_dtype is None else jnp.dtype(out_dtype)
    compute_dtype = (
        jnp.dtype(z.dtype) if compute_dtype is None else jnp.dtype(compute_dtype)
    )

    # ---- dropout (training-mode only), on the tiny (N, D) latent matrix ----
    if training and dropout > 0.0:
        if rng_key is None:
            raise ValueError("training-mode dropout requires rng_key")
        keep = jax.random.bernoulli(rng_key, 1.0 - dropout, z.shape)
        z = jnp.where(keep, z / (1.0 - dropout), jnp.zeros((), z.dtype))
    # TODO(synk): arbitrary `act` callables (module default is sigmoid) are not
    # supported; only sigmoid is implemented in-kernel.

    # ---- pad K (latent dim) up to a multiple of 128; zeros don't change z@z.T
    dk = _round_up(D, 128)
    zp = z if dk == D else jnp.pad(z, ((0, 0), (0, dk - D)))
    if compute_dtype != zp.dtype:
        zp = zp.astype(compute_dtype)
    z_t = zp.T  # (dk, N): lane-dense column blocks, natural (K, N) MXU layout.

    # ---- tile selection: clamp to (aligned) problem size for small N --------
    tm = max(8, min(tm, _round_up(N, 8)))       # sublane-aligned row tile
    tn = max(128, min(tn, _round_up(N, 128)))   # lane-aligned col tile

    grid = (pl.cdiv(N, tm), pl.cdiv(N, tn))

    # ---- VMEM budget (generation-aware cap) ---------------------------------
    try:
        vmem_cap = int(pltpu.get_tpu_info().vmem_capacity_bytes)
    except Exception:  # pragma: no cover - conservative fallback
        vmem_cap = 64 * 1024 * 1024
    in_sz = compute_dtype.itemsize
    out_sz = out_dtype.itemsize
    vmem_need = (
        2 * (tm * dk + dk * tn) * in_sz  # double-buffered input blocks
        + 2 * tm * tn * out_sz           # double-buffered output tile
        + tm * tn * 4                    # f32 logits intermediate
    )
    vmem_limit = int(min(vmem_cap // 2, max(16 * 1024 * 1024, 2 * vmem_need)))

    adj = pl.pallas_call(
        _inner_product_decoder_kernel,
        out_shape=jax.ShapeDtypeStruct((N, N), out_dtype),
        grid_spec=pltpu.PrefetchScalarGridSpec(
            num_scalar_prefetch=0,
            grid=grid,
            in_specs=[
                # row block of z: (tm, dk) at row-block i (resident across j).
                pl.BlockSpec((tm, dk), lambda i, j: (i, 0)),
                # column block of z^T: (dk, tn) at col-block j.
                pl.BlockSpec((dk, tn), lambda i, j: (0, j)),
            ],
            out_specs=pl.BlockSpec((tm, tn), lambda i, j: (i, j)),
        ),
        compiler_params=pltpu.CompilerParams(
            dimension_semantics=("parallel", "parallel"),
            vmem_limit_bytes=vmem_limit,
        ),
    )(zp, z_t)

    return adj


if __name__ == "__main__":
    key = jax.random.PRNGKey(0)

    # Case 1: aligned shapes (N multiple of 128, D = 128).
    N1, D1 = 256, 128
    z1 = jax.random.normal(key, (N1, D1), dtype=jnp.float32)
    adj1 = jax.block_until_ready(inner_product_decoder(z1, dropout=0.0))
    ref1 = jax.nn.sigmoid(z1 @ z1.T)
    assert adj1.shape == (N1, N1)
    assert jnp.allclose(adj1, ref1, atol=1e-5, rtol=1e-5)

    # Case 2: ragged shapes (N not a multiple of 128, D < 128) to exercise the
    # masked edge tiles and the K zero-padding path.
    N2, D2 = 200, 64
    z2 = jax.random.normal(jax.random.PRNGKey(1), (N2, D2), dtype=jnp.float32)
    adj2 = jax.block_until_ready(inner_product_decoder(z2, dropout=0.2))  # eval
    ref2 = jax.nn.sigmoid(z2 @ z2.T)
    assert adj2.shape == (N2, N2)
    assert jnp.allclose(adj2, ref2, atol=1e-5, rtol=1e-5)

    print("KERNEL_OK")
</pallas_src>

<mosaic_0001>
module attributes {stable_mosaic.version = 11 : i64} {
  func.func @_inner_product_decoder_kernel(%arg0: i32, %arg1: i32, %arg2: memref<256x128xf32, #tpu.memory_space<vmem>>, %arg3: memref<128x256xf32, #tpu.memory_space<vmem>>, %arg4: memref<256x256xf32, #tpu.memory_space<vmem>>) attributes {dimension_semantics = [#tpu.dimension_semantics<parallel>, #tpu.dimension_semantics<parallel>], iteration_bounds = array<i64: 1, 1>, scalar_prefetch = 0 : i64, scratch_operands = 0 : i64, tpu.core_type = #tpu.core_type<tc>, window_params = [{transform_indices = @transform_0, window_bounds = array<i64: 256, 128>}, {transform_indices = @transform_1, window_bounds = array<i64: 128, 256>}, {transform_indices = @transform_2, window_bounds = array<i64: 256, 256>}]} {
    %c0 = arith.constant 0 : index
    %c0_0 = arith.constant 0 : index
    %0 = vector.load %arg2[%c0, %c0_0] : memref<256x128xf32, #tpu.memory_space<vmem>>, vector<256x128xf32>
    %c0_1 = arith.constant 0 : index
    %c0_2 = arith.constant 0 : index
    %1 = vector.load %arg3[%c0_1, %c0_2] : memref<128x256xf32, #tpu.memory_space<vmem>>, vector<128x256xf32>
    %cst = arith.constant dense<0.000000e+00> : vector<256x256xf32>
    %2 = tpu.matmul %0, %1, %cst {dimension_numbers = #tpu.dot_dimension_numbers<[1], [0], [0], [1], [0, 0, 1, 1], [], []>} : vector<256x128xf32>, vector<128x256xf32>, vector<256x256xf32> -> vector<256x256xf32>
    %cst_3 = arith.constant 5.000000e-01 : f32
    %3 = vector.broadcast %cst_3 : f32 to vector<256x256xf32>
    %4 = arith.mulf %3, %2 : vector<256x256xf32>
    %5 = math.tanh %4 : vector<256x256xf32>
    %cst_4 = arith.constant 5.000000e-01 : f32
    %6 = vector.broadcast %cst_4 : f32 to vector<256x256xf32>
    %7 = arith.mulf %6, %5 : vector<256x256xf32>
    %cst_5 = arith.constant 5.000000e-01 : f32
    %8 = vector.broadcast %cst_5 : f32 to vector<256x256xf32>
    %9 = arith.addf %7, %8 : vector<256x256xf32>
    %c0_6 = arith.constant 0 : index
    %c0_7 = arith.constant 0 : index
    %10 = vector.load %arg4[%c0_6, %c0_7] : memref<256x256xf32, #tpu.memory_space<vmem>>, vector<256x256xf32>
    tpu.vector_store %arg4[%c0_6, %c0_7], %9 {strides = array<i32>} : memref<256x256xf32, #tpu.memory_space<vmem>>, vector<256x256xf32>,
    return
  }
  func.func @transform_0(%arg0: i32, %arg1: i32) -> (i32, i32) {
    %c0_i32 = arith.constant 0 : i32
    %c0_i32_0 = arith.constant 0 : i32
    return %arg0, %c0_i32 : i32, i32
  }
  func.func @transform_1(%arg0: i32, %arg1: i32) -> (i32, i32) {
    %c0_i32 = arith.constant 0 : i32
    %c0_i32_0 = arith.constant 0 : i32
    return %c0_i32, %arg1 : i32, i32
  }
  func.func @transform_2(%arg0: i32, %arg1: i32) -> (i32, i32) {
    %c0_i32 = arith.constant 0 : i32
    return %arg0, %arg1 : i32, i32
  }
}

</mosaic_0001>

<bundles_post_ra>
// kernel: tpu_custom_call.1
= control target key start
LH: loop header
LB: loop body
LE: loop exit
PB: predicated region body
PF: predicated region fallthrough
CT: control target
= control target key end

     0   :  { %7 = vsyncpa [#allocation3], 0  ;;  %s1003_s0 = inlined_call_operand.hbm [shape: f32[256,128], index: 0, kind: input, shape index: {}]   ;;  %s1004_s1 = inlined_call_operand.hbm [shape: f32[128,256], index: 1, kind: input, shape index: {}]   ;;  %s1005_s2 = inlined_call_operand.hbm [shape: f32[256,256], index: 2, kind: output, shape index: {}]  }
   0x1   :  { %8 = vsyncpa [#allocation6], 0 }
   0x2   :  { %9 = vsyncpa [#allocation4], 0  ;;  %s933_s9 = smov [#allocation2]  }
   0x3   :  { %s15_s10 = sshll.u32 %s933_s9, 4  ;;  %s16_s10 = int_to_ptr.vmem [resolvable:$true] %s15_s10 }
   0x4   :  { %s875_s11 = scalar_lea.vmem %s16_s10, 4096  ;;  %p880_p1 = scmp.lt.s32.totalorder %s16_s10, %s16_s10 }
   0x5   :  { %p876_p0 = scmp.ne.s32.totalorder %s16_s10, %s875_s11  ;;  %p881_p2 = scmp.lt.s32.totalorder %s875_s11, %s875_s11 }
   0x7   :  { %p882_p3 = por %p881_p2, %p880_p1 }
   0x9   :  { %p883_p4 = pnand %p882_p3, %p876_p0 }
   0xb   :  { %886 = shalt.err (!%p883_p4)
}
   0xc   :  { %s934_s12 = smov 128   ;;  %s935_s13 = smov 8  }
   0xd   :  { %21 = dma.hbm_to_vmem [thread:$0]  %s1003_s0, 4096, %s16_s10, [#allocation3], %s934_s12, %s934_s12, %s935_s13  }
   0xe   :  { %s936_s16 = smov [#allocation5]  }
   0xf   :  { %s27_s17 = sshll.u32 %s936_s16, 4  ;;  %s28_s17 = int_to_ptr.vmem [resolvable:$true] %s27_s17 }
  0x10   :  { %s895_s18 = scalar_lea.vmem %s28_s17, 4096  ;;  %p900_p6 = scmp.lt.s32.totalorder %s28_s17, %s28_s17 }
  0x11   :  { %p896_p5 = scmp.ne.s32.totalorder %s28_s17, %s895_s18  ;;  %p901_p7 = scmp.lt.s32.totalorder %s895_s18, %s895_s18 }
  0x13   :  { %p902_p8 = por %p901_p7, %p900_p6 }
  0x15   :  { %p903_p9 = pnand %p902_p8, %p896_p5 }
  0x17   :  { %906 = shalt.err (!%p903_p9)
}
  0x18   :  { %s937_s19 = smov 256   ;;  %s938_s20 = smov 16  }
  0x19   :  { %33 = dma.hbm_to_vmem [thread:$0]  %s1004_s1, 4096, %s28_s17, [#allocation6], %s937_s19, %s937_s19, %s938_s20  }
  0x1a   :  { %927 = dma.done.wait [#allocation3], 4096  }
  0x1b   :  { %928 = vsyncadd [#allocation3], 4294963200 }
  0x1c   :  { %929 = dma.done.wait [#allocation6], 4096  }
  0x1d   :  { %930 = vsyncadd [#allocation6], 4294963200  ;;  %v939_v0 = vmov 0.0   ;;  %v103_v1 = vld [vmem:[#allocation5 + $0xf8] sm:$0xff]  ;;  %v102_v2 = vld [vmem:[#allocation5 + $0xf0] sm:$0xff]  ;;  %s940_s0 = smov [#allocation7]  }
  0x1e   :  { %168 = vmatprep.mubr.f32.mxu0 %v939_v0  ;;  %264 = vmatprep.mubr.f32.mxu1 %v939_v0  ;;  %v101_v3 = vld [vmem:[#allocation5 + $0xe8] sm:$0xff]  ;;  %v100_v4 = vld [vmem:[#allocation5 + $0xe0] sm:$0xff]  ;;  %v99_v5 = vld [vmem:[#allocation5 + $0xd8] sm:$0xff]  ;;  %s686_s1 = sshll.u32 %s940_s0, 4  ;;  %s687_s1 = int_to_ptr.vmem [resolvable:$true] %s686_s1 }
  0x1f   :  { %104 = vmatprep.subr.mxu0 %v103_v1  ;;  %699 = vmatprep.subr.mxu1 %v103_v1  ;;  %v98_v6 = vld [vmem:[#allocation5 + $0xd0] sm:$0xff]  ;;  %v97_v7 = vld [vmem:[#allocation5 + $0xc8] sm:$0xff]  ;;  %v96_v8 = vld [vmem:[#allocation5 + $0xc0] sm:$0xff]  ;;  %s907_s23 = scalar_lea.vmem %s687_s1, 8192  ;;  %p912_p11 = scmp.lt.s32.totalorder %s687_s1, %s687_s1 }
  0x20   :  { %105 = vmatpush1.msra.mxu0 %v102_v2  ;;  %715 = vmatpush1.msra.mxu1 %v102_v2  ;;  %v95_v9 = vld [vmem:[#allocation5 + $0xb8] sm:$0xff]  ;;  %v94_v10 = vld [vmem:[#allocation5 + $0xb0] sm:$0xff]  ;;  %v93_v11 = vld [vmem:[#allocation5 + $0xa8] sm:$0xff]  ;;  %p908_p10 = scmp.ne.s32.totalorder %s687_s1, %s907_s23  ;;  %p913_p12 = scmp.lt.s32.totalorder %s907_s23, %s907_s23 }
  0x21   :  { %106 = vmatprep.subr.mxu0 %v101_v3  ;;  %700 = vmatprep.subr.mxu1 %v101_v3  ;;  %v92_v12 = vld [vmem:[#allocation5 + $0xa0] sm:$0xff]  ;;  %v91_v13 = vld [vmem:[#allocation5 + $0x98] sm:$0xff]  ;;  %v90_v14 = vld [vmem:[#allocation5 + $0x90] sm:$0xff] }
  0x22   :  { %107 = vmatpush1.msra.mxu0 %v100_v4  ;;  %716 = vmatpush1.msra.mxu1 %v100_v4  ;;  %v89_v15 = vld [vmem:[#allocation5 + $0x88] sm:$0xff]  ;;  %v88_v16 = vld [vmem:[#allocation5 + $0x80] sm:$0xff]  ;;  %v87_v17 = vld [vmem:[#allocation5 + $0x78] sm:$0xff]  ;;  %p914_p13 = por %p913_p12, %p912_p11 }
  0x23   :  { %108 = vmatprep.subr.mxu0 %v99_v5  ;;  %701 = vmatprep.subr.mxu1 %v99_v5  ;;  %v86_v18 = vld [vmem:[#allocation5 + $0x70] sm:$0xff]  ;;  %v85_v19 = vld [vmem:[#allocation5 + $0x68] sm:$0xff]  ;;  %v84_v20 = vld [vmem:[#allocation5 + $0x60] sm:$0xff] }
  0x24   :  { %109 = vmatpush1.msra.mxu0 %v98_v6  ;;  %717 = vmatpush1.msra.mxu1 %v98_v6  ;;  %v83_v21 = vld [vmem:[#allocation5 + $0x58] sm:$0xff]  ;;  %v82_v22 = vld [vmem:[#allocation5 + $0x50] sm:$0xff]  ;;  %v81_v23 = vld [vmem:[#allocation5 + $0x48] sm:$0xff]  ;;  %p915_p0 = pnand %p914_p13, %p908_p10 }
  0x25   :  { %110 = vmatprep.subr.mxu0 %v97_v7  ;;  %702 = vmatprep.subr.mxu1 %v97_v7  ;;  %v80_v24 = vld [vmem:[#allocation5 + $0x40] sm:$0xff]  ;;  %v79_v25 = vld [vmem:[#allocation5 + $0x38] sm:$0xff]  ;;  %v78_v26 = vld [vmem:[#allocation5 + $0x30] sm:$0xff] }
  0x26   :  { %111 = vmatpush1.msra.mxu0 %v96_v8  ;;  %718 = vmatpush1.msra.mxu1 %v96_v8  ;;  %v77_v27 = vld [vmem:[#allocation5 + $0x28] sm:$0xff]  ;;  %v76_v28 = vld [vmem:[#allocation5 + $0x20] sm:$0xff]  ;;  %v75_v29 = vld [vmem:[#allocation5 + $0x18] sm:$0xff] }
  0x27   :  { %112 = vmatprep.subr.mxu0 %v95_v9  ;;  %703 = vmatprep.subr.mxu1 %v95_v9  ;;  %v74_v30 = vld [vmem:[#allocation5 + $0x10] sm:$0xff]  ;;  %v73_v31 = vld [vmem:[#allocation5 + $0x8] sm:$0xff]  ;;  %v72_v32 = vld [vmem:[#allocation5] sm:$0xff] }
  0x28   :  { %113 = vmatpush1.msra.mxu0 %v94_v10  ;;  %719 = vmatpush1.msra.mxu1 %v94_v10  ;;  %v40_v33 = vld [vmem:[#allocation2] sm:$0xff]  ;;  %v41_v35 = vld [vmem:[#allocation2 + $0x8] sm:$0xff]  ;;  %v42_v37 = vld [vmem:[#allocation2 + $0x10] sm:$0xff] }
  0x29   :  { %114 = vmatprep.subr.mxu0 %v93_v11  ;;  %704 = vmatprep.subr.mxu1 %v93_v11  ;;  %v56_v34 = vld [vmem:[#allocation2 + $0x80] sm:$0xff]  ;;  %v57_v36 = vld [vmem:[#allocation2 + $0x88] sm:$0xff]  ;;  %v58_v38 = vld [vmem:[#allocation2 + $0x90] sm:$0xff] }
  0x2a   :  { %115 = vmatpush1.msra.mxu0 %v92_v12  ;;  %720 = vmatpush1.msra.mxu1 %v92_v12  ;;  %v43_v39 = vld [vmem:[#allocation2 + $0x18] sm:$0xff]  ;;  %v44_v41 = vld [vmem:[#allocation2 + $0x20] sm:$0xff]  ;;  %v45_v43 = vld [vmem:[#allocation2 + $0x28] sm:$0xff] }
  0x2b   :  { %116 = vmatprep.subr.mxu0 %v91_v13  ;;  %705 = vmatprep.subr.mxu1 %v91_v13  ;;  %v59_v40 = vld [vmem:[#allocation2 + $0x98] sm:$0xff]  ;;  %v60_v42 = vld [vmem:[#allocation2 + $0xa0] sm:$0xff]  ;;  %v61_v44 = vld [vmem:[#allocation2 + $0xa8] sm:$0xff] }
  0x2c   :  { %117 = vmatpush1.msra.mxu0 %v90_v14  ;;  %721 = vmatpush1.msra.mxu1 %v90_v14  ;;  %v46_v45 = vld [vmem:[#allocation2 + $0x30] sm:$0xff]  ;;  %v47_v47 = vld [vmem:[#allocation2 + $0x38] sm:$0xff]  ;;  %v48_v49 = vld [vmem:[#allocation2 + $0x40] sm:$0xff] }
  0x2d   :  { %118 = vmatprep.subr.mxu0 %v89_v15  ;;  %706 = vmatprep.subr.mxu1 %v89_v15  ;;  %v62_v46 = vld [vmem:[#allocation2 + $0xb0] sm:$0xff]  ;;  %v63_v48 = vld [vmem:[#allocation2 + $0xb8] sm:$0xff]  ;;  %v64_v50 = vld [vmem:[#allocation2 + $0xc0] sm:$0xff] }
  0x2e   :  { %119 = vmatpush1.msra.mxu0 %v88_v16  ;;  %722 = vmatpush1.msra.mxu1 %v88_v16  ;;  %v49_v51 = vld [vmem:[#allocation2 + $0x48] sm:$0xff]  ;;  %v50_v53 = vld [vmem:[#allocation2 + $0x50] sm:$0xff]  ;;  %v51_v55 = vld [vmem:[#allocation2 + $0x58] sm:$0xff] }
  0x2f   :  { %120 = vmatprep.subr.mxu0 %v87_v17  ;;  %707 = vmatprep.subr.mxu1 %v87_v17  ;;  %v65_v52 = vld [vmem:[#allocation2 + $0xc8] sm:$0xff]  ;;  %v66_v54 = vld [vmem:[#allocation2 + $0xd0] sm:$0xff]  ;;  %v67_v56 = vld [vmem:[#allocation2 + $0xd8] sm:$0xff] }
  0x30   :  { %121 = vmatpush1.msra.mxu0 %v86_v18  ;;  %723 = vmatpush1.msra.mxu1 %v86_v18  ;;  %v52_v57 = vld [vmem:[#allocation2 + $0x60] sm:$0xff]  ;;  %v53_v59 = vld [vmem:[#allocation2 + $0x68] sm:$0xff]  ;;  %v54_v61 = vld [vmem:[#allocation2 + $0x70] sm:$0xff] }
  0x31   :  { %122 = vmatprep.subr.mxu0 %v85_v19  ;;  %708 = vmatprep.subr.mxu1 %v85_v19  ;;  %v68_v58 = vld [vmem:[#allocation2 + $0xe0] sm:$0xff]  ;;  %v69_v60 = vld [vmem:[#allocation2 + $0xe8] sm:$0xff]  ;;  %v70_v62 = vld [vmem:[#allocation2 + $0xf0] sm:$0xff] }
  0x32   :  { %123 = vmatpush1.msra.mxu0 %v84_v20  ;;  %724 = vmatpush1.msra.mxu1 %v84_v20  ;;  %v55_v63 = vld [vmem:[#allocation2 + $0x78] sm:$0xff] }
  0x33   :  { %124 = vmatprep.subr.mxu0 %v83_v21  ;;  %709 = vmatprep.subr.mxu1 %v83_v21  ;;  %v71_v1 = vld [vmem:[#allocation2 + $0xf8] sm:$0xff] }
  0x34   :  { %125 = vmatpush1.msra.mxu0 %v82_v22  ;;  %725 = vmatpush1.msra.mxu1 %v82_v22 }
  0x35   :  { %126 = vmatprep.subr.mxu0 %v81_v23  ;;  %710 = vmatprep.subr.mxu1 %v81_v23 }
  0x36   :  { %127 = vmatpush1.msra.mxu0 %v80_v24  ;;  %726 = vmatpush1.msra.mxu1 %v80_v24 }
  0x37   :  { %128 = vmatprep.subr.mxu0 %v79_v25  ;;  %711 = vmatprep.subr.mxu1 %v79_v25 }
  0x38   :  { %129 = vmatpush1.msra.mxu0 %v78_v26  ;;  %727 = vmatpush1.msra.mxu1 %v78_v26 }
  0x39   :  { %130 = vmatprep.subr.mxu0 %v77_v27  ;;  %712 = vmatprep.subr.mxu1 %v77_v27 }
  0x3a   :  { %131 = vmatpush1.msra.mxu0 %v76_v28  ;;  %728 = vmatpush1.msra.mxu1 %v76_v28 }
  0x3b   :  { %132 = vmatprep.subr.mxu0 %v75_v29  ;;  %713 = vmatprep.subr.mxu1 %v75_v29 }
  0x3c   :  { %133 = vmatpush1.msra.mxu0 %v74_v30  ;;  %729 = vmatpush1.msra.mxu1 %v74_v30 }
  0x3d   :  { %134 = vmatprep.subr.mxu0 %v73_v31  ;;  %714 = vmatprep.subr.mxu1 %v73_v31 }
  0x3e   :  { %135 = vmatpush1.msra.mxu0 %v72_v32  ;;  %730 = vmatpush1.msra.mxu1 %v72_v32 }
  0x3f   :  { %169 = vmatmul.mubr.f32.vlgmr.msra.gmra.mxu0 %v40_v33  ;;  %265 = vmatmul.mubr.f32.vlgmr.msra.gmra.mxu1 %v56_v34 }
  0x40   :  { %174 = vmatprep.mubr.f32.mxu0 %v939_v0  ;;  %270 = vmatprep.mubr.f32.mxu1 %v939_v0 }
  0x43   :  { %175 = vmatmul.mubr.f32.gmra.mxu0 %v41_v35  ;;  %271 = vmatmul.mubr.f32.gmra.mxu1 %v57_v36 }
  0x44   :  { %180 = vmatprep.mubr.f32.mxu0 %v939_v0  ;;  %276 = vmatprep.mubr.f32.mxu1 %v939_v0 }
  0x47   :  { %181 = vmatmul.mubr.f32.gmra.mxu0 %v42_v37  ;;  %277 = vmatmul.mubr.f32.gmra.mxu1 %v58_v38 }
  0x48   :  { %186 = vmatprep.mubr.f32.mxu0 %v939_v0  ;;  %282 = vmatprep.mubr.f32.mxu1 %v939_v0 }
  0x4b   :  { %187 = vmatmul.mubr.f32.gmra.mxu0 %v43_v39  ;;  %283 = vmatmul.mubr.f32.gmra.mxu1 %v59_v40 }
  0x4c   :  { %192 = vmatprep.mubr.f32.mxu0 %v939_v0  ;;  %288 = vmatprep.mubr.f32.mxu1 %v939_v0 }
  0x4f   :  { %193 = vmatmul.mubr.f32.gmra.mxu0 %v44_v41  ;;  %289 = vmatmul.mubr.f32.gmra.mxu1 %v60_v42 }
  0x50   :  { %198 = vmatprep.mubr.f32.mxu0 %v939_v0  ;;  %294 = vmatprep.mubr.f32.mxu1 %v939_v0 }
  0x53   :  { %199 = vmatmul.mubr.f32.gmra.mxu0 %v45_v43  ;;  %295 = vmatmul.mubr.f32.gmra.mxu1 %v61_v44 }
  0x54   :  { %204 = vmatprep.mubr.f32.mxu0 %v939_v0  ;;  %300 = vmatprep.mubr.f32.mxu1 %v939_v0 }
  0x57   :  { %205 = vmatmul.mubr.f32.gmra.mxu0 %v46_v45  ;;  %301 = vmatmul.mubr.f32.gmra.mxu1 %v62_v46 }
  0x58   :  { %210 = vmatprep.mubr.f32.mxu0 %v939_v0  ;;  %306 = vmatprep.mubr.f32.mxu1 %v939_v0 }
  0x5b   :  { %211 = vmatmul.mubr.f32.gmra.mxu0 %v47_v47  ;;  %307 = vmatmul.mubr.f32.gmra.mxu1 %v63_v48 }
  0x5c   :  { %216 = vmatprep.mubr.f32.mxu0 %v939_v0  ;;  %312 = vmatprep.mubr.f32.mxu1 %v939_v0 }
  0x5f   :  { %217 = vmatmul.mubr.f32.gmra.mxu0 %v48_v49  ;;  %313 = vmatmul.mubr.f32.gmra.mxu1 %v64_v50 }
  0x60   :  { %222 = vmatprep.mubr.f32.mxu0 %v939_v0  ;;  %318 = vmatprep.mubr.f32.mxu1 %v939_v0 }
  0x63   :  { %223 = vmatmul.mubr.f32.gmra.mxu0 %v49_v51  ;;  %319 = vmatmul.mubr.f32.gmra.mxu1 %v65_v52 }
  0x64   :  { %228 = vmatprep.mubr.f32.mxu0 %v939_v0  ;;  %324 = vmatprep.mubr.f32.mxu1 %v939_v0 }
  0x67   :  { %229 = vmatmul.mubr.f32.gmra.mxu0 %v50_v53  ;;  %325 = vmatmul.mubr.f32.gmra.mxu1 %v66_v54 }
  0x68   :  { %234 = vmatprep.mubr.f32.mxu0 %v939_v0  ;;  %330 = vmatprep.mubr.f32.mxu1 %v939_v0 }
  0x6b   :  { %235 = vmatmul.mubr.f32.gmra.mxu0 %v51_v55  ;;  %331 = vmatmul.mubr.f32.gmra.mxu1 %v67_v56 }
  0x6c   :  { %240 = vmatprep.mubr.f32.mxu0 %v939_v0  ;;  %336 = vmatprep.mubr.f32.mxu1 %v939_v0 }
  0x6f   :  { %241 = vmatmul.mubr.f32.gmra.mxu0 %v52_v57  ;;  %337 = vmatmul.mubr.f32.gmra.mxu1 %v68_v58 }
  0x70   :  { %246 = vmatprep.mubr.f32.mxu0 %v939_v0  ;;  %342 = vmatprep.mubr.f32.mxu1 %v939_v0 }
  0x73   :  { %247 = vmatmul.mubr.f32.gmra.mxu0 %v53_v59  ;;  %343 = vmatmul.mubr.f32.gmra.mxu1 %v69_v60 }
  0x74   :  { %252 = vmatprep.mubr.f32.mxu0 %v939_v0  ;;  %348 = vmatprep.mubr.f32.mxu1 %v939_v0 }
  0x77   :  { %253 = vmatmul.mubr.f32.gmra.mxu0 %v54_v61  ;;  %349 = vmatmul.mubr.f32.gmra.mxu1 %v70_v62 }
  0x78   :  { %258 = vmatprep.mubr.f32.mxu0 %v939_v0  ;;  %354 = vmatprep.mubr.f32.mxu1 %v939_v0 }
  0x7b   :  { %259 = vmatmul.mubr.f32.gmra.mxu0 %v55_v63  ;;  %355 = vmatmul.mubr.f32.gmra.mxu1 %v71_v1 }
  0xff   :  { %v170_v2 = vpop.f32.mrf.mxu0  ;;  %v266_v3 = vpop.f32.mrf.mxu1 }
 0x100   :  { %v361_v4 = vmul.f32 0.5, %v170_v2  ;;  %v393_v5 = vmul.f32 0.5, %v266_v3 }
 0x101   :  { %v172_v6 = vpop.f32.mrf.mxu0  ;;  %v268_v7 = vpop.f32.mrf.mxu1 }
 0x102   :  { %739 = vtanh.f32 %v361_v4  ;;  %v362_v8 = vmul.f32 0.5, %v172_v6  ;;  %v394_v9 = vmul.f32 0.5, %v268_v7 }
 0x103   :  { %741 = vtanh.f32 %v393_v5  ;;  %v176_v10 = vpop.f32.mrf.mxu0  ;;  %v272_v11 = vpop.f32.mrf.mxu1 }
 0x104   :  { %743 = vtanh.f32 %v362_v8  ;;  %v363_v12 = vmul.f32 0.5, %v176_v10  ;;  %v395_v13 = vmul.f32 0.5, %v272_v11 }
 0x105   :  { %745 = vtanh.f32 %v394_v9  ;;  %v178_v0 = vpop.f32.mrf.mxu0  ;;  %v274_v14 = vpop.f32.mrf.mxu1 }
 0x106   :  { %747 = vtanh.f32 %v363_v12  ;;  %v364_v15 = vmul.f32 0.5, %v178_v0  ;;  %v396_v16 = vmul.f32 0.5, %v274_v14 }
 0x107   :  { %749 = vtanh.f32 %v395_v13  ;;  %v182_v17 = vpop.f32.mrf.mxu0  ;;  %v278_v18 = vpop.f32.mrf.mxu1 }
 0x108   :  { %751 = vtanh.f32 %v364_v15  ;;  %v365_v19 = vmul.f32 0.5, %v182_v17  ;;  %v397_v20 = vmul.f32 0.5, %v278_v18 }
 0x109   :  { %753 = vtanh.f32 %v396_v16  ;;  %v184_v21 = vpop.f32.mrf.mxu0  ;;  %v280_v22 = vpop.f32.mrf.mxu1 }
 0x10a   :  { %755 = vtanh.f32 %v365_v19  ;;  %v366_v23 = vmul.f32 0.5, %v184_v21  ;;  %v398_v24 = vmul.f32 0.5, %v280_v22 }
 0x10b   :  { %757 = vtanh.f32 %v397_v20  ;;  %v188_v25 = vpop.f32.mrf.mxu0  ;;  %v284_v26 = vpop.f32.mrf.mxu1 }
 0x10c   :  { %759 = vtanh.f32 %v366_v23  ;;  %v367_v27 = vmul.f32 0.5, %v188_v25  ;;  %v399_v28 = vmul.f32 0.5, %v284_v26 }
 0x10d   :  { %761 = vtanh.f32 %v398_v24  ;;  %v190_v29 = vpop.f32.mrf.mxu0  ;;  %v286_v30 = vpop.f32.mrf.mxu1 }
 0x10e   :  { %763 = vtanh.f32 %v367_v27  ;;  %v368_v31 = vmul.f32 0.5, %v190_v29  ;;  %v400_v32 = vmul.f32 0.5, %v286_v30 }
 0x10f   :  { %v740_v33 = vpop.eup %739  ;;  %765 = vtanh.f32 %v399_v28  ;;  %v194_v34 = vpop.f32.mrf.mxu0 }
 0x110   :  { %v290_v35 = vpop.f32.mrf.mxu1  ;;  %v742_v36 = vpop.eup %741  ;;  %v489_v37 = vmul.f32 0.5, %v740_v33  ;;  %767 = vtanh.f32 %v368_v31  ;;  %v369_v38 = vmul.f32 0.5, %v194_v34 }
 0x111   :  { %v401_v39 = vmul.f32 0.5, %v290_v35  ;;  %v744_v40 = vpop.eup %743  ;;  %v521_v41 = vmul.f32 0.5, %v742_v36  ;;  %769 = vtanh.f32 %v400_v32  ;;  %v196_v42 = vpop.f32.mrf.mxu0 }
 0x112   :  { %v292_v43 = vpop.f32.mrf.mxu1  ;;  %v746_v44 = vpop.eup %745  ;;  %v553_v45 = vadd.f32 0.5, %v489_v37  ;;  %v490_v46 = vmul.f32 0.5, %v744_v40  ;;  %771 = vtanh.f32 %v369_v38  ;;  %v370_v47 = vmul.f32 0.5, %v196_v42 }
 0x113   :  { %v748_v48 = vpop.eup %747  ;;  %v585_v49 = vadd.f32 0.5, %v521_v41  ;;  %v522_v50 = vmul.f32 0.5, %v746_v44  ;;  %773 = vtanh.f32 %v401_v39  ;;  %v402_v51 = vmul.f32 0.5, %v292_v43  ;;  %v200_v52 = vpop.f32.mrf.mxu0 }
 0x114   :  { %v296_v53 = vpop.f32.mrf.mxu1  ;;  %v750_v54 = vpop.eup %749  ;;  %617 = vst [vmem:[#allocation7] sm:$0xff] %v553_v45  ;;  %v554_v55 = vadd.f32 0.5, %v490_v46  ;;  %v491_v56 = vmul.f32 0.5, %v748_v48  ;;  %775 = vtanh.f32 %v370_v47  ;;  %v371_v57 = vmul.f32 0.5, %v200_v52 }
 0x115   :  { %v752_v58 = vpop.eup %751  ;;  %649 = vst [vmem:[#allocation7 + $0x100] sm:$0xff] %v585_v49  ;;  %v586_v59 = vadd.f32 0.5, %v522_v50  ;;  %v523_v60 = vmul.f32 0.5, %v750_v54  ;;  %777 = vtanh.f32 %v402_v51  ;;  %v403_v61 = vmul.f32 0.5, %v296_v53  ;;  %v202_v62 = vpop.f32.mrf.mxu0 }
 0x116   :  { %v298_v63 = vpop.f32.mrf.mxu1  ;;  %v754_v1 = vpop.eup %753  ;;  %618 = vst [vmem:[#allocation7 + $0x8] sm:$0xff] %v554_v55  ;;  %v555_v2 = vadd.f32 0.5, %v491_v56  ;;  %v492_v3 = vmul.f32 0.5, %v752_v58  ;;  %779 = vtanh.f32 %v371_v57  ;;  %v372_v4 = vmul.f32 0.5, %v202_v62 }
 0x117   :  { %v756_v5 = vpop.eup %755  ;;  %650 = vst [vmem:[#allocation7 + $0x108] sm:$0xff] %v586_v59  ;;  %v587_v6 = vadd.f32 0.5, %v523_v60  ;;  %v524_v7 = vmul.f32 0.5, %v754_v1  ;;  %781 = vtanh.f32 %v403_v61  ;;  %v404_v8 = vmul.f32 0.5, %v298_v63  ;;  %v206_v9 = vpop.f32.mrf.mxu0 }
 0x118   :  { %v302_v10 = vpop.f32.mrf.mxu1  ;;  %v758_v11 = vpop.eup %757  ;;  %619 = vst [vmem:[#allocation7 + $0x10] sm:$0xff] %v555_v2  ;;  %v556_v12 = vadd.f32 0.5, %v492_v3  ;;  %v493_v13 = vmul.f32 0.5, %v756_v5  ;;  %783 = vtanh.f32 %v372_v4  ;;  %v373_v0 = vmul.f32 0.5, %v206_v9 }
 0x119   :  { %v760_v14 = vpop.eup %759  ;;  %651 = vst [vmem:[#allocation7 + $0x110] sm:$0xff] %v587_v6  ;;  %v588_v15 = vadd.f32 0.5, %v524_v7  ;;  %v525_v16 = vmul.f32 0.5, %v758_v11  ;;  %785 = vtanh.f32 %v404_v8  ;;  %v405_v17 = vmul.f32 0.5, %v302_v10  ;;  %v208_v18 = vpop.f32.mrf.mxu0 }
 0x11a   :  { %v304_v19 = vpop.f32.mrf.mxu1  ;;  %v762_v20 = vpop.eup %761  ;;  %620 = vst [vmem:[#allocation7 + $0x18] sm:$0xff] %v556_v12  ;;  %v557_v21 = vadd.f32 0.5, %v493_v13  ;;  %v494_v22 = vmul.f32 0.5, %v760_v14  ;;  %787 = vtanh.f32 %v373_v0  ;;  %v374_v23 = vmul.f32 0.5, %v208_v18 }
 0x11b   :  { %v764_v24 = vpop.eup %763  ;;  %652 = vst [vmem:[#allocation7 + $0x118] sm:$0xff] %v588_v15  ;;  %v589_v25 = vadd.f32 0.5, %v525_v16  ;;  %v526_v26 = vmul.f32 0.5, %v762_v20  ;;  %789 = vtanh.f32 %v405_v17  ;;  %v406_v27 = vmul.f32 0.5, %v304_v19  ;;  %v212_v28 = vpop.f32.mrf.mxu0 }
 0x11c   :  { %v308_v29 = vpop.f32.mrf.mxu1  ;;  %v766_v30 = vpop.eup %765  ;;  %621 = vst [vmem:[#allocation7 + $0x20] sm:$0xff] %v557_v21  ;;  %v558_v31 = vadd.f32 0.5, %v494_v22  ;;  %v495_v32 = vmul.f32 0.5, %v764_v24  ;;  %791 = vtanh.f32 %v374_v23  ;;  %v375_v33 = vmul.f32 0.5, %v212_v28 }
 0x11d   :  { %v768_v34 = vpop.eup %767  ;;  %653 = vst [vmem:[#allocation7 + $0x120] sm:$0xff] %v589_v25  ;;  %v590_v35 = vadd.f32 0.5, %v526_v26  ;;  %v527_v36 = vmul.f32 0.5, %v766_v30  ;;  %793 = vtanh.f32 %v406_v27  ;;  %v407_v37 = vmul.f32 0.5, %v308_v29  ;;  %v214_v38 = vpop.f32.mrf.mxu0 }
 0x11e   :  { %v310_v39 = vpop.f32.mrf.mxu1  ;;  %v770_v40 = vpop.eup %769  ;;  %622 = vst [vmem:[#allocation7 + $0x28] sm:$0xff] %v558_v31  ;;  %v559_v41 = vadd.f32 0.5, %v495_v32  ;;  %v496_v42 = vmul.f32 0.5, %v768_v34  ;;  %795 = vtanh.f32 %v375_v33  ;;  %v376_v43 = vmul.f32 0.5, %v214_v38 }
 0x11f   :  { %v772_v44 = vpop.eup %771  ;;  %654 = vst [vmem:[#allocation7 + $0x128] sm:$0xff] %v590_v35  ;;  %v591_v45 = vadd.f32 0.5, %v527_v36  ;;  %v528_v46 = vmul.f32 0.5, %v770_v40  ;;  %797 = vtanh.f32 %v407_v37  ;;  %v408_v47 = vmul.f32 0.5, %v310_v39  ;;  %v218_v48 = vpop.f32.mrf.mxu0 }
 0x120   :  { %v314_v49 = vpop.f32.mrf.mxu1  ;;  %v774_v50 = vpop.eup %773  ;;  %623 = vst [vmem:[#allocation7 + $0x30] sm:$0xff] %v559_v41  ;;  %v560_v51 = vadd.f32 0.5, %v496_v42  ;;  %v497_v52 = vmul.f32 0.5, %v772_v44  ;;  %799 = vtanh.f32 %v376_v43  ;;  %v377_v53 = vmul.f32 0.5, %v218_v48 }
 0x121   :  { %v776_v54 = vpop.eup %775  ;;  %655 = vst [vmem:[#allocation7 + $0x130] sm:$0xff] %v591_v45  ;;  %v592_v55 = vadd.f32 0.5, %v528_v46  ;;  %v529_v56 = vmul.f32 0.5, %v774_v50  ;;  %801 = vtanh.f32 %v408_v47  ;;  %v409_v57 = vmul.f32 0.5, %v314_v49  ;;  %v220_v58 = vpop.f32.mrf.mxu0 }
 0x122   :  { %v316_v59 = vpop.f32.mrf.mxu1  ;;  %v778_v60 = vpop.eup %777  ;;  %624 = vst [vmem:[#allocation7 + $0x38] sm:$0xff] %v560_v51  ;;  %v561_v61 = vadd.f32 0.5, %v497_v52  ;;  %v498_v62 = vmul.f32 0.5, %v776_v54  ;;  %803 = vtanh.f32 %v377_v53  ;;  %v378_v63 = vmul.f32 0.5, %v220_v58 }
 0x123   :  { %v780_v1 = vpop.eup %779  ;;  %656 = vst [vmem:[#allocation7 + $0x138] sm:$0xff] %v592_v55  ;;  %v593_v2 = vadd.f32 0.5, %v529_v56  ;;  %v530_v3 = vmul.f32 0.5, %v778_v60  ;;  %805 = vtanh.f32 %v409_v57  ;;  %v410_v4 = vmul.f32 0.5, %v316_v59  ;;  %v224_v5 = vpop.f32.mrf.mxu0 }
 0x124   :  { %v320_v6 = vpop.f32.mrf.mxu1  ;;  %v782_v7 = vpop.eup %781  ;;  %625 = vst [vmem:[#allocation7 + $0x40] sm:$0xff] %v561_v61  ;;  %v562_v8 = vadd.f32 0.5, %v498_v62  ;;  %v499_v9 = vmul.f32 0.5, %v780_v1  ;;  %807 = vtanh.f32 %v378_v63  ;;  %v379_v10 = vmul.f32 0.5, %v224_v5 }
 0x125   :  { %v784_v11 = vpop.eup %783  ;;  %657 = vst [vmem:[#allocation7 + $0x140] sm:$0xff] %v593_v2  ;;  %v594_v12 = vadd.f32 0.5, %v530_v3  ;;  %v531_v13 = vmul.f32 0.5, %v782_v7  ;;  %809 = vtanh.f32 %v410_v4  ;;  %v411_v0 = vmul.f32 0.5, %v320_v6  ;;  %v226_v14 = vpop.f32.mrf.mxu0 }
 0x126   :  { %v322_v15 = vpop.f32.mrf.mxu1  ;;  %v786_v16 = vpop.eup %785  ;;  %626 = vst [vmem:[#allocation7 + $0x48] sm:$0xff] %v562_v8  ;;  %v563_v17 = vadd.f32 0.5, %v499_v9  ;;  %v500_v18 = vmul.f32 0.5, %v784_v11  ;;  %811 = vtanh.f32 %v379_v10  ;;  %v380_v19 = vmul.f32 0.5, %v226_v14 }
 0x127   :  { %v788_v20 = vpop.eup %787  ;;  %658 = vst [vmem:[#allocation7 + $0x148] sm:$0xff] %v594_v12  ;;  %v595_v21 = vadd.f32 0.5, %v531_v13  ;;  %v532_v22 = vmul.f32 0.5, %v786_v16  ;;  %813 = vtanh.f32 %v411_v0  ;;  %v412_v23 = vmul.f32 0.5, %v322_v15  ;;  %v230_v24 = vpop.f32.mrf.mxu0 }
 0x128   :  { %v326_v25 = vpop.f32.mrf.mxu1  ;;  %v790_v26 = vpop.eup %789  ;;  %627 = vst [vmem:[#allocation7 + $0x50] sm:$0xff] %v563_v17  ;;  %v564_v27 = vadd.f32 0.5, %v500_v18  ;;  %v501_v28 = vmul.f32 0.5, %v788_v20  ;;  %815 = vtanh.f32 %v380_v19  ;;  %v381_v29 = vmul.f32 0.5, %v230_v24 }
 0x129   :  { %v792_v30 = vpop.eup %791  ;;  %659 = vst [vmem:[#allocation7 + $0x150] sm:$0xff] %v595_v21  ;;  %v596_v31 = vadd.f32 0.5, %v532_v22  ;;  %v533_v32 = vmul.f32 0.5, %v790_v26  ;;  %817 = vtanh.f32 %v412_v23  ;;  %v413_v33 = vmul.f32 0.5, %v326_v25  ;;  %v232_v34 = vpop.f32.mrf.mxu0 }
 0x12a   :  { %v328_v35 = vpop.f32.mrf.mxu1  ;;  %v794_v36 = vpop.eup %793  ;;  %628 = vst [vmem:[#allocation7 + $0x58] sm:$0xff] %v564_v27  ;;  %v565_v37 = vadd.f32 0.5, %v501_v28  ;;  %v502_v38 = vmul.f32 0.5, %v792_v30  ;;  %819 = vtanh.f32 %v381_v29  ;;  %v382_v39 = vmul.f32 0.5, %v232_v34 }
 0x12b   :  { %v796_v40 = vpop.eup %795  ;;  %660 = vst [vmem:[#allocation7 + $0x158] sm:$0xff] %v596_v31  ;;  %v597_v41 = vadd.f32 0.5, %v533_v32  ;;  %v534_v42 = vmul.f32 0.5, %v794_v36  ;;  %821 = vtanh.f32 %v413_v33  ;;  %v414_v43 = vmul.f32 0.5, %v328_v35  ;;  %v236_v44 = vpop.f32.mrf.mxu0 }
 0x12c   :  { %v332_v45 = vpop.f32.mrf.mxu1  ;;  %v798_v46 = vpop.eup %797  ;;  %629 = vst [vmem:[#allocation7 + $0x60] sm:$0xff] %v565_v37  ;;  %v566_v47 = vadd.f32 0.5, %v502_v38  ;;  %v503_v48 = vmul.f32 0.5, %v796_v40  ;;  %823 = vtanh.f32 %v382_v39  ;;  %v383_v49 = vmul.f32 0.5, %v236_v44 }
 0x12d   :  { %v800_v50 = vpop.eup %799  ;;  %661 = vst [vmem:[#allocation7 + $0x160] sm:$0xff] %v597_v41  ;;  %v598_v51 = vadd.f32 0.5, %v534_v42  ;;  %v535_v52 = vmul.f32 0.5, %v798_v46  ;;  %825 = vtanh.f32 %v414_v43  ;;  %v415_v53 = vmul.f32 0.5, %v332_v45  ;;  %v238_v54 = vpop.f32.mrf.mxu0 }
 0x12e   :  { %v334_v55 = vpop.f32.mrf.mxu1  ;;  %v802_v56 = vpop.eup %801  ;;  %630 = vst [vmem:[#allocation7 + $0x68] sm:$0xff] %v566_v47  ;;  %v567_v57 = vadd.f32 0.5, %v503_v48  ;;  %v504_v58 = vmul.f32 0.5, %v800_v50  ;;  %827 = vtanh.f32 %v383_v49  ;;  %v384_v59 = vmul.f32 0.5, %v238_v54 }
 0x12f   :  { %v804_v60 = vpop.eup %803  ;;  %662 = vst [vmem:[#allocation7 + $0x168] sm:$0xff] %v598_v51  ;;  %v599_v61 = vadd.f32 0.5, %v535_v52  ;;  %v536_v62 = vmul.f32 0.5, %v802_v56  ;;  %829 = vtanh.f32 %v415_v53  ;;  %v416_v63 = vmul.f32 0.5, %v334_v55  ;;  %v242_v1 = vpop.f32.mrf.mxu0 }
 0x130   :  { %v338_v2 = vpop.f32.mrf.mxu1  ;;  %v806_v3 = vpop.eup %805  ;;  %631 = vst [vmem:[#allocation7 + $0x70] sm:$0xff] %v567_v57  ;;  %v568_v4 = vadd.f32 0.5, %v504_v58  ;;  %v505_v5 = vmul.f32 0.5, %v804_v60  ;;  %831 = vtanh.f32 %v384_v59  ;;  %v385_v6 = vmul.f32 0.5, %v242_v1 }
 0x131   :  { %v808_v7 = vpop.eup %807  ;;  %663 = vst [vmem:[#allocation7 + $0x170] sm:$0xff] %v599_v61  ;;  %v600_v8 = vadd.f32 0.5, %v536_v62  ;;  %v537_v9 = vmul.f32 0.5, %v806_v3  ;;  %833 = vtanh.f32 %v416_v63  ;;  %v417_v10 = vmul.f32 0.5, %v338_v2  ;;  %v244_v11 = vpop.f32.mrf.mxu0 }
 0x132   :  { %v340_v12 = vpop.f32.mrf.mxu1  ;;  %v810_v13 = vpop.eup %809  ;;  %632 = vst [vmem:[#allocation7 + $0x78] sm:$0xff] %v568_v4  ;;  %v569_v0 = vadd.f32 0.5, %v505_v5  ;;  %v506_v14 = vmul.f32 0.5, %v808_v7  ;;  %835 = vtanh.f32 %v385_v6  ;;  %v386_v15 = vmul.f32 0.5, %v244_v11 }
 0x133   :  { %v812_v16 = vpop.eup %811  ;;  %664 = vst [vmem:[#allocation7 + $0x178] sm:$0xff] %v600_v8  ;;  %v601_v17 = vadd.f32 0.5, %v537_v9  ;;  %v538_v18 = vmul.f32 0.5, %v810_v13  ;;  %837 = vtanh.f32 %v417_v10  ;;  %v418_v19 = vmul.f32 0.5, %v340_v12  ;;  %v248_v20 = vpop.f32.mrf.mxu0 }
 0x134   :  { %v344_v21 = vpop.f32.mrf.mxu1  ;;  %v814_v22 = vpop.eup %813  ;;  %633 = vst [vmem:[#allocation7 + $0x80] sm:$0xff] %v569_v0  ;;  %v570_v23 = vadd.f32 0.5, %v506_v14  ;;  %v507_v24 = vmul.f32 0.5, %v812_v16  ;;  %839 = vtanh.f32 %v386_v15  ;;  %v387_v25 = vmul.f32 0.5, %v248_v20 }
 0x135   :  { %v816_v26 = vpop.eup %815  ;;  %665 = vst [vmem:[#allocation7 + $0x180] sm:$0xff] %v601_v17  ;;  %v602_v27 = vadd.f32 0.5, %v538_v18  ;;  %v539_v28 = vmul.f32 0.5, %v814_v22  ;;  %841 = vtanh.f32 %v418_v19  ;;  %v419_v29 = vmul.f32 0.5, %v344_v21  ;;  %v250_v30 = vpop.f32.mrf.mxu0 }
 0x136   :  { %v346_v31 = vpop.f32.mrf.mxu1  ;;  %v818_v32 = vpop.eup %817  ;;  %634 = vst [vmem:[#allocation7 + $0x88] sm:$0xff] %v570_v23  ;;  %v571_v33 = vadd.f32 0.5, %v507_v24  ;;  %v508_v34 = vmul.f32 0.5, %v816_v26  ;;  %843 = vtanh.f32 %v387_v25  ;;  %v388_v35 = vmul.f32 0.5, %v250_v30 }
 0x137   :  { %v820_v36 = vpop.eup %819  ;;  %666 = vst [vmem:[#allocation7 + $0x188] sm:$0xff] %v602_v27  ;;  %v603_v37 = vadd.f32 0.5, %v539_v28  ;;  %v540_v38 = vmul.f32 0.5, %v818_v32  ;;  %845 = vtanh.f32 %v419_v29  ;;  %v420_v39 = vmul.f32 0.5, %v346_v31  ;;  %v254_v40 = vpop.f32.mrf.mxu0 }
 0x138   :  { %v350_v41 = vpop.f32.mrf.mxu1  ;;  %v822_v42 = vpop.eup %821  ;;  %635 = vst [vmem:[#allocation7 + $0x90] sm:$0xff] %v571_v33  ;;  %v572_v43 = vadd.f32 0.5, %v508_v34  ;;  %v509_v44 = vmul.f32 0.5, %v820_v36  ;;  %847 = vtanh.f32 %v388_v35  ;;  %v389_v45 = vmul.f32 0.5, %v254_v40 }
 0x139   :  { %v824_v46 = vpop.eup %823  ;;  %667 = vst [vmem:[#allocation7 + $0x190] sm:$0xff] %v603_v37  ;;  %v604_v47 = vadd.f32 0.5, %v540_v38  ;;  %v541_v48 = vmul.f32 0.5, %v822_v42  ;;  %849 = vtanh.f32 %v420_v39  ;;  %v421_v49 = vmul.f32 0.5, %v350_v41  ;;  %v256_v50 = vpop.f32.mrf.mxu0 }
 0x13a   :  { %v352_v51 = vpop.f32.mrf.mxu1  ;;  %v826_v52 = vpop.eup %825  ;;  %636 = vst [vmem:[#allocation7 + $0x98] sm:$0xff] %v572_v43  ;;  %v573_v53 = vadd.f32 0.5, %v509_v44  ;;  %v510_v54 = vmul.f32 0.5, %v824_v46  ;;  %851 = vtanh.f32 %v389_v45  ;;  %v390_v55 = vmul.f32 0.5, %v256_v50 }
 0x13b   :  { %v828_v56 = vpop.eup %827  ;;  %668 = vst [vmem:[#allocation7 + $0x198] sm:$0xff] %v604_v47  ;;  %v605_v57 = vadd.f32 0.5, %v541_v48  ;;  %v542_v58 = vmul.f32 0.5, %v826_v52  ;;  %853 = vtanh.f32 %v421_v49  ;;  %v422_v59 = vmul.f32 0.5, %v352_v51  ;;  %v260_v60 = vpop.f32.mrf.mxu0 }
 0x13c   :  { %v356_v61 = vpop.f32.mrf.mxu1  ;;  %v830_v62 = vpop.eup %829  ;;  %637 = vst [vmem:[#allocation7 + $0xa0] sm:$0xff] %v573_v53  ;;  %v574_v63 = vadd.f32 0.5, %v510_v54  ;;  %v511_v1 = vmul.f32 0.5, %v828_v56  ;;  %855 = vtanh.f32 %v390_v55  ;;  %v391_v2 = vmul.f32 0.5, %v260_v60 }
 0x13d   :  { %v832_v3 = vpop.eup %831  ;;  %669 = vst [vmem:[#allocation7 + $0x1a0] sm:$0xff] %v605_v57  ;;  %v606_v4 = vadd.f32 0.5, %v542_v58  ;;  %v543_v5 = vmul.f32 0.5, %v830_v62  ;;  %857 = vtanh.f32 %v422_v59  ;;  %v423_v6 = vmul.f32 0.5, %v356_v61  ;;  %v262_v7 = vpop.f32.mrf.mxu0 }
 0x13e   :  { %v358_v8 = vpop.f32.mrf.mxu1  ;;  %v834_v9 = vpop.eup %833  ;;  %638 = vst [vmem:[#allocation7 + $0xa8] sm:$0xff] %v574_v63  ;;  %v575_v10 = vadd.f32 0.5, %v511_v1  ;;  %v512_v11 = vmul.f32 0.5, %v832_v3  ;;  %859 = vtanh.f32 %v391_v2  ;;  %v392_v12 = vmul.f32 0.5, %v262_v7 }
 0x13f   :  { %v836_v13 = vpop.eup %835  ;;  %670 = vst [vmem:[#allocation7 + $0x1a8] sm:$0xff] %v606_v4  ;;  %v607_v0 = vadd.f32 0.5, %v543_v5  ;;  %v544_v14 = vmul.f32 0.5, %v834_v9  ;;  %861 = vtanh.f32 %v423_v6  ;;  %v424_v15 = vmul.f32 0.5, %v358_v8 }
 0x140   :  { %v838_v16 = vpop.eup %837  ;;  %639 = vst [vmem:[#allocation7 + $0xb0] sm:$0xff] %v575_v10  ;;  %v576_v17 = vadd.f32 0.5, %v512_v11  ;;  %v513_v18 = vmul.f32 0.5, %v836_v13  ;;  %863 = vtanh.f32 %v392_v12 }
 0x141   :  { %v840_v19 = vpop.eup %839  ;;  %671 = vst [vmem:[#allocation7 + $0x1b0] sm:$0xff] %v607_v0  ;;  %v608_v20 = vadd.f32 0.5, %v544_v14  ;;  %v545_v21 = vmul.f32 0.5, %v838_v16  ;;  %865 = vtanh.f32 %v424_v15 }
 0x142   :  { %v842_v22 = vpop.eup %841  ;;  %640 = vst [vmem:[#allocation7 + $0xb8] sm:$0xff] %v576_v17  ;;  %v577_v23 = vadd.f32 0.5, %v513_v18  ;;  %v514_v24 = vmul.f32 0.5, %v840_v19 }
 0x143   :  { %v844_v25 = vpop.eup %843  ;;  %672 = vst [vmem:[#allocation7 + $0x1b8] sm:$0xff] %v608_v20  ;;  %v609_v26 = vadd.f32 0.5, %v545_v21  ;;  %v546_v27 = vmul.f32 0.5, %v842_v22 }
 0x144   :  { %v846_v28 = vpop.eup %845  ;;  %641 = vst [vmem:[#allocation7 + $0xc0] sm:$0xff] %v577_v23  ;;  %v578_v29 = vadd.f32 0.5, %v514_v24  ;;  %v515_v30 = vmul.f32 0.5, %v844_v25 }
 0x145   :  { %v848_v31 = vpop.eup %847  ;;  %673 = vst [vmem:[#allocation7 + $0x1c0] sm:$0xff] %v609_v26  ;;  %v610_v32 = vadd.f32 0.5, %v546_v27  ;;  %v547_v33 = vmul.f32 0.5, %v846_v28 }
 0x146   :  { %v850_v34 = vpop.eup %849  ;;  %642 = vst [vmem:[#allocation7 + $0xc8] sm:$0xff] %v578_v29  ;;  %v579_v35 = vadd.f32 0.5, %v515_v30  ;;  %v516_v36 = vmul.f32 0.5, %v848_v31 }
 0x147   :  { %v852_v37 = vpop.eup %851  ;;  %674 = vst [vmem:[#allocation7 + $0x1c8] sm:$0xff] %v610_v32  ;;  %v611_v38 = vadd.f32 0.5, %v547_v33  ;;  %v548_v39 = vmul.f32 0.5, %v850_v34 }
 0x148   :  { %v854_v40 = vpop.eup %853  ;;  %643 = vst [vmem:[#allocation7 + $0xd0] sm:$0xff] %v579_v35  ;;  %v580_v41 = vadd.f32 0.5, %v516_v36  ;;  %v517_v42 = vmul.f32 0.5, %v852_v37 }
 0x149   :  { %v856_v43 = vpop.eup %855  ;;  %675 = vst [vmem:[#allocation7 + $0x1d0] sm:$0xff] %v611_v38  ;;  %v612_v44 = vadd.f32 0.5, %v548_v39  ;;  %v549_v45 = vmul.f32 0.5, %v854_v40 }
 0x14a   :  { %v858_v46 = vpop.eup %857  ;;  %644 = vst [vmem:[#allocation7 + $0xd8] sm:$0xff] %v580_v41  ;;  %v581_v47 = vadd.f32 0.5, %v517_v42  ;;  %v518_v48 = vmul.f32 0.5, %v856_v43 }
 0x14b   :  { %v860_v49 = vpop.eup %859  ;;  %676 = vst [vmem:[#allocation7 + $0x1d8] sm:$0xff] %v612_v44  ;;  %v613_v50 = vadd.f32 0.5, %v549_v45  ;;  %v550_v51 = vmul.f32 0.5, %v858_v46 }
 0x14c   :  { %v862_v52 = vpop.eup %861  ;;  %645 = vst [vmem:[#allocation7 + $0xe0] sm:$0xff] %v581_v47  ;;  %v582_v53 = vadd.f32 0.5, %v518_v48  ;;  %v519_v54 = vmul.f32 0.5, %v860_v49 }
 0x14d   :  { %v864_v55 = vpop.eup %863  ;;  %677 = vst [vmem:[#allocation7 + $0x1e0] sm:$0xff] %v613_v50  ;;  %v614_v56 = vadd.f32 0.5, %v550_v51  ;;  %v551_v57 = vmul.f32 0.5, %v862_v52 }
 0x14e   :  { %v866_v58 = vpop.eup %865  ;;  %646 = vst [vmem:[#allocation7 + $0xe8] sm:$0xff] %v582_v53  ;;  %v583_v59 = vadd.f32 0.5, %v519_v54  ;;  %v520_v60 = vmul.f32 0.5, %v864_v55 }
 0x14f   :  { %678 = vst [vmem:[#allocation7 + $0x1e8] sm:$0xff] %v614_v56  ;;  %v615_v61 = vadd.f32 0.5, %v551_v57  ;;  %v552_v62 = vmul.f32 0.5, %v866_v58 }
 0x150   :  { %647 = vst [vmem:[#allocation7 + $0xf0] sm:$0xff] %v583_v59  ;;  %v584_v63 = vadd.f32 0.5, %v520_v60 }
 0x151   :  { %679 = vst [vmem:[#allocation7 + $0x1f0] sm:$0xff] %v615_v61  ;;  %v616_v1 = vadd.f32 0.5, %v552_v62 }
 0x152   :  { %648 = vst [vmem:[#allocation7 + $0xf8] sm:$0xff] %v584_v63 }
 0x153   :  { %680 = vst [vmem:[#allocation7 + $0x1f8] sm:$0xff] %v616_v1 }
 0x154   :  { %918 = shalt.err (!%p915_p0)
}
 0x155   :  { %692 = dma.vmem_to_hbm [thread:$0]  %s687_s1, 8192, %s1005_s2, [#allocation4], %s937_s19, %s937_s19, %s938_s20  }
 0x156   :  { %931 = dma.done.wait [#allocation4], 8192  }
 0x157   :  { %932 = vsyncadd [#allocation4], 4294959104 }
 0x158   :  { %696 = vsyncpa [#allocation3], 1 }
 0x159   :  { %697 = vsyncpa [#allocation6], 1 }
 0x15a   :  { %698 = vsyncpa [#allocation4], 1 }

</bundles_post_ra>
